<compile_context>
chip_gen: v7x
topology: tpu7x:2x2x1
jax: 0.10.0
libtpu: 0.0.40
codegen_flags: <defaults>
</compile_context>

<pallas_src>
import jax
import jax.numpy as jnp
from jax.experimental import pallas as pl
from jax.experimental.pallas import tpu as pltpu


def _policy_kernel(xT_ref, w1_ref, b1_ref, w2_ref, b2_ref, oT_ref):
    # xT_ref: (obs_dim, TB)   observations, batch on lanes
    # w1_ref: (H, obs_dim)    PyTorch-layout l1.weight
    # b1_ref: (H, 1)          l1.bias (column)
    # w2_ref: (A, H)          PyTorch-layout l2.weight  (A == 2)
    # b2_ref: (A, 1)          l2.bias (column)
    # oT_ref: (A, TB)         action probabilities, batch on lanes
    xT = xT_ref[...].astype(jnp.bfloat16)      # bf16 MXU operands,
    w1 = w1_ref[...].astype(jnp.bfloat16)      # f32 accumulation

    # Layer 1 + ReLU:  h^T = relu(W1 @ x^T + b1)        -> (H, TB)
    hT = jnp.dot(w1, xT, preferred_element_type=jnp.float32) + b1_ref[...]
    hT = jnp.maximum(hT, 0.0)                  # elementwise in f32 (v5e-safe)

    # Layer 2:  logits^T = W2 @ h^T + b2                -> (A, TB)
    w2 = w2_ref[...].astype(jnp.bfloat16)
    logitsT = (
        jnp.dot(w2, hT.astype(jnp.bfloat16), preferred_element_type=jnp.float32)
        + b2_ref[...]
    )

    # Softmax over the A == 2 action rows, closed form (one exp, no reductions):
    #   p0 = 1 / (1 + exp(l1 - l0)),   p1 = 1 - p0
    # Overflow-safe: exp -> inf  =>  p0 -> 0, p1 -> 1.
    l0 = logitsT[0:1, :]
    l1 = logitsT[1:2, :]
    e = jnp.exp(l1 - l0)                                 # (1, TB), EUP
    p0 = pl.reciprocal(1.0 + e, approx=False)            # exact reciprocal
    oT_ref[0:1, :] = p0.astype(oT_ref.dtype)
    oT_ref[1:2, :] = (1.0 - p0).astype(oT_ref.dtype)


def _pick_batch_tile(B):
    """Largest lane-aligned (x128) tile that divides B, keeps >= 2 grid steps,
    and stays <= 4096 rows (keeps per-tile VMEM tiny even on v7x's 64 MiB)."""
    if B % 128 != 0 or B < 256:
        return B            # single full-extent tile (block dim == array dim is legal)
    cap = min(B // 2, 4096)
    tile = 128
    while tile * 2 <= cap and B % (tile * 2) == 0:
        tile *= 2
    return tile


def nn_policy_forward(x, w1, b1, w2, b2, *, batch_tile=None):
    """Forward pass of NNPolicy.

    x:  (B, 4) float32 observations
    w1: (H, 4), b1: (H, 1)   -- PyTorch nn.Linear(4, H) layout
    w2: (A, H), b2: (A, 1)   -- PyTorch nn.Linear(H, A) layout, A == 2
    returns (B, A) float32 action probabilities.
    """
    B, obs_dim = x.shape
    H, _ = w1.shape
    A, _ = w2.shape

    if batch_tile is None:
        batch_tile = _pick_batch_tile(B)
    assert B % batch_tile == 0, "batch_tile must divide the batch size"
    assert batch_tile == B or batch_tile % 128 == 0, (
        "batch_tile must be a multiple of 128 (lane axis) unless it equals B")
    num_tiles = B // batch_tile

    # Batch on the lane axis: lane-dense loads/stores, dense VPU/EUP softmax work.
    xT = x.T                                   # (obs_dim, B); cheap XLA transpose

    # Deeper input buffering only pays off once the grid has several steps.
    if num_tiles >= 3:
        x_spec = pl.BlockSpec((obs_dim, batch_tile), lambda i: (0, i),
                              pipeline_mode=pl.Buffered(3))
    else:
        x_spec = pl.BlockSpec((obs_dim, batch_tile), lambda i: (0, i))

    flops = 2 * B * (obs_dim * H + H * A)
    bytes_accessed = (
        x.size * x.dtype.itemsize
        + (w1.size + b1.size + w2.size + b2.size) * 4
        + B * A * 4
    )
    cost = pl.CostEstimate(flops=flops, transcendentals=B,
                           bytes_accessed=bytes_accessed)

    outT = pl.pallas_call(
        _policy_kernel,
        out_shape=jax.ShapeDtypeStruct((A, B), jnp.float32),
        grid_spec=pltpu.PrefetchScalarGridSpec(
            num_scalar_prefetch=0,
            grid=(num_tiles,),
            in_specs=[
                x_spec,                                         # x^T tile (lane-dense)
                pl.BlockSpec((H, obs_dim), lambda i: (0, 0)),   # W1 (resident)
                pl.BlockSpec((H, 1), lambda i: (0, 0)),         # b1
                pl.BlockSpec((A, H), lambda i: (0, 0)),         # W2 (resident)
                pl.BlockSpec((A, 1), lambda i: (0, 0)),         # b2
            ],
            out_specs=pl.BlockSpec((A, batch_tile), lambda i: (0, i)),
        ),
        compiler_params=pltpu.CompilerParams(
            dimension_semantics=("parallel",),   # batch tiles shard across TCs (v7x)
        ),
        cost_estimate=cost,
    )(xT, w1, b1, w2, b2)

    return outT.T                               # back to (B, A)


def init_params(key, obs_dim=4, num_hidden=128, num_actions=2):
    """Deterministic PyTorch-style (uniform +/- 1/sqrt(fan_in)) init, (out, in) layout."""
    k1, k2, k3, k4 = jax.random.split(key, 4)
    bound1 = 1.0 / jnp.sqrt(obs_dim)
    bound2 = 1.0 / jnp.sqrt(num_hidden)
    w1 = jax.random.uniform(k1, (num_hidden, obs_dim), jnp.float32, -bound1, bound1)
    b1 = jax.random.uniform(k2, (num_hidden, 1), jnp.float32, -bound1, bound1)
    w2 = jax.random.uniform(k3, (num_actions, num_hidden), jnp.float32, -bound2, bound2)
    b2 = jax.random.uniform(k4, (num_actions, 1), jnp.float32, -bound2, bound2)
    return w1, b1, w2, b2


def reference_forward_f32(x, w1, b1, w2, b2):
    """Pure-f32 reference matching the PyTorch module exactly."""
    h = jnp.maximum(x @ w1.T + b1[:, 0], 0.0)
    logits = h @ w2.T + b2[:, 0]
    return jax.nn.softmax(logits, axis=-1)


def reference_forward_bf16(x, w1, b1, w2, b2):
    """Reference mimicking the kernel's numerics (bf16 MXU operands, f32 accumulate)."""
    hT = jnp.dot(w1.astype(jnp.bfloat16), x.T.astype(jnp.bfloat16),
                 preferred_element_type=jnp.float32) + b1
    hT = jnp.maximum(hT, 0.0)
    logitsT = jnp.dot(w2.astype(jnp.bfloat16), hT.astype(jnp.bfloat16),
                      preferred_element_type=jnp.float32) + b2
    return jax.nn.softmax(logitsT, axis=0).T


if __name__ == "__main__":
    key = jax.random.PRNGKey(0)
    kp, kx = jax.random.split(key)

    # Small shapes consistent with the module: obs_dim=4, hidden=128, actions=2.
    # Batch 256 -> two lane-dense 128-wide tiles (exercises the pipelined path).
    B, OBS, H, A = 256, 4, 128, 2
    w1, b1, w2, b2 = init_params(kp, OBS, H, A)
    x = jax.random.normal(kx, (B, OBS), jnp.float32)

    probs = nn_policy_forward(x, w1, b1, w2, b2)
    probs = jax.block_until_ready(probs)

    assert probs.shape == (B, A)

    ref_exact = reference_forward_bf16(x, w1, b1, w2, b2)   # same numerics as kernel
    ref_f32 = reference_forward_f32(x, w1, b1, w2, b2)      # original module numerics

    assert jnp.allclose(probs, ref_exact, atol=1e-4, rtol=1e-4), \
        "mismatch vs bf16-matched JAX reference"
    assert jnp.allclose(probs, ref_f32, atol=2e-2), \
        "mismatch vs f32 module reference (beyond bf16 tolerance)"
    assert jnp.allclose(jnp.sum(probs, axis=-1), 1.0, atol=1e-5), \
        "rows must sum to 1"

    print("KERNEL_OK")
</pallas_src>

<mosaic_0001>
module attributes {stable_mosaic.version = 11 : i64} {
  func.func @_policy_kernel(%arg0: i32, %arg1: memref<4x128xf32, #tpu.memory_space<vmem>>, %arg2: memref<128x4xf32, #tpu.memory_space<vmem>>, %arg3: memref<128x1xf32, #tpu.memory_space<vmem>>, %arg4: memref<2x128xf32, #tpu.memory_space<vmem>>, %arg5: memref<2x1xf32, #tpu.memory_space<vmem>>, %arg6: memref<2x128xf32, #tpu.memory_space<vmem>>) attributes {dimension_semantics = [#tpu.dimension_semantics<parallel>], iteration_bounds = array<i64: 2>, scalar_prefetch = 0 : i64, scratch_operands = 0 : i64, tpu.core_type = #tpu.core_type<tc>, window_params = [{transform_indices = @transform_0, window_bounds = array<i64: 4, 128>}, {pipeline_mode = #tpu.pipeline_mode<synchronous>, transform_indices = @transform_1, window_bounds = array<i64: 128, 4>}, {pipeline_mode = #tpu.pipeline_mode<synchronous>, transform_indices = @transform_2, window_bounds = array<i64: 128, 1>}, {pipeline_mode = #tpu.pipeline_mode<synchronous>, transform_indices = @transform_3, window_bounds = array<i64: 2, 128>}, {pipeline_mode = #tpu.pipeline_mode<synchronous>, transform_indices = @transform_4, window_bounds = array<i64: 2, 1>}, {transform_indices = @transform_5, window_bounds = array<i64: 2, 128>}]} {
    %c0 = arith.constant 0 : index
    %c0_0 = arith.constant 0 : index
    %0 = vector.load %arg1[%c0, %c0_0] : memref<4x128xf32, #tpu.memory_space<vmem>>, vector<4x128xf32>
    %1 = arith.truncf %0 : vector<4x128xf32> to vector<4x128xbf16>
    %c0_1 = arith.constant 0 : index
    %c0_2 = arith.constant 0 : index
    %2 = vector.load %arg2[%c0_1, %c0_2] : memref<128x4xf32, #tpu.memory_space<vmem>>, vector<128x4xf32>
    %3 = arith.truncf %2 : vector<128x4xf32> to vector<128x4xbf16>
    %cst = arith.constant dense<0.000000e+00> : vector<128x128xf32>
    %4 = tpu.matmul %3, %1, %cst {dimension_numbers = #tpu.dot_dimension_numbers<[1], [0], [0], [1], [0, 0, 1, 1], [], []>} : vector<128x4xbf16>, vector<4x128xbf16>, vector<128x128xf32> -> vector<128x128xf32>
    %c0_3 = arith.constant 0 : index
    %c0_4 = arith.constant 0 : index
    %5 = vector.load %arg3[%c0_3, %c0_4] : memref<128x1xf32, #tpu.memory_space<vmem>>, vector<128x1xf32>
    %6 = vector.broadcast %5 : vector<128x1xf32> to vector<128x128xf32>
    %7 = arith.addf %4, %6 : vector<128x128xf32>
    %cst_5 = arith.constant 0.000000e+00 : f32
    %8 = vector.broadcast %cst_5 : f32 to vector<128x128xf32>
    %9 = arith.maximumf %7, %8 : vector<128x128xf32>
    %c0_6 = arith.constant 0 : index
    %c0_7 = arith.constant 0 : index
    %10 = vector.load %arg4[%c0_6, %c0_7] : memref<2x128xf32, #tpu.memory_space<vmem>>, vector<2x128xf32>
    %11 = arith.truncf %10 : vector<2x128xf32> to vector<2x128xbf16>
    %12 = arith.truncf %9 : vector<128x128xf32> to vector<128x128xbf16>
    %cst_8 = arith.constant dense<0.000000e+00> : vector<2x128xf32>
    %13 = tpu.matmul %11, %12, %cst_8 {dimension_numbers = #tpu.dot_dimension_numbers<[1], [0], [0], [1], [0, 0, 1, 1], [], []>} : vector<2x128xbf16>, vector<128x128xbf16>, vector<2x128xf32> -> vector<2x128xf32>
    %c0_9 = arith.constant 0 : index
    %c0_10 = arith.constant 0 : index
    %14 = vector.load %arg5[%c0_9, %c0_10] : memref<2x1xf32, #tpu.memory_space<vmem>>, vector<2x1xf32>
    %15 = vector.broadcast %14 : vector<2x1xf32> to vector<2x128xf32>
    %16 = arith.addf %13, %15 : vector<2x128xf32>
    %17 = vector.extract_strided_slice %16 {offsets = [0, 0], sizes = [1, 128], strides = [1, 1]} : vector<2x128xf32> to vector<1x128xf32>
    %18 = vector.extract_strided_slice %16 {offsets = [1, 0], sizes = [1, 128], strides = [1, 1]} : vector<2x128xf32> to vector<1x128xf32>
    %19 = arith.subf %18, %17 : vector<1x128xf32>
    %20 = math.exp %19 : vector<1x128xf32>
    %cst_11 = arith.constant 1.000000e+00 : f32
    %21 = vector.broadcast %cst_11 : f32 to vector<1x128xf32>
    %22 = arith.addf %21, %20 : vector<1x128xf32>
    %23 = tpu.reciprocal %22 : vector<1x128xf32> -> vector<1x128xf32>
    %c0_12 = arith.constant 0 : index
    %c0_13 = arith.constant 0 : index
    %24 = vector.load %arg6[%c0_12, %c0_13] : memref<2x128xf32, #tpu.memory_space<vmem>>, vector<1x128xf32>
    tpu.vector_store %arg6[%c0_12, %c0_13], %23 {strides = array<i32>} : memref<2x128xf32, #tpu.memory_space<vmem>>, vector<1x128xf32>,
    %cst_14 = arith.constant 1.000000e+00 : f32
    %25 = vector.broadcast %cst_14 : f32 to vector<1x128xf32>
    %26 = arith.subf %25, %23 : vector<1x128xf32>
    %c1 = arith.constant 1 : index
    %c0_15 = arith.constant 0 : index
    %27 = vector.load %arg6[%c1, %c0_15] : memref<2x128xf32, #tpu.memory_space<vmem>>, vector<1x128xf32>
    tpu.vector_store %arg6[%c1, %c0_15], %26 {strides = array<i32>} : memref<2x128xf32, #tpu.memory_space<vmem>>, vector<1x128xf32>,
    return
  }
  func.func @transform_0(%arg0: i32) -> (i32, i32) {
    %c0_i32 = arith.constant 0 : i32
    %c0_i32_0 = arith.constant 0 : i32
    return %c0_i32, %arg0 : i32, i32
  }
  func.func @transform_1(%arg0: i32) -> (i32, i32) {
    %c0_i32 = arith.constant 0 : i32
    %c0_i32_0 = arith.constant 0 : i32
    %c0_i32_1 = arith.constant 0 : i32
    return %c0_i32, %c0_i32_0 : i32, i32
  }
  func.func @transform_2(%arg0: i32) -> (i32, i32) {
    %c0_i32 = arith.constant 0 : i32
    %c0_i32_0 = arith.constant 0 : i32
    %c0_i32_1 = arith.constant 0 : i32
    return %c0_i32, %c0_i32_0 : i32, i32
  }
  func.func @transform_3(%arg0: i32) -> (i32, i32) {
    %c0_i32 = arith.constant 0 : i32
    %c0_i32_0 = arith.constant 0 : i32
    %c0_i32_1 = arith.constant 0 : i32
    return %c0_i32, %c0_i32_0 : i32, i32
  }
  func.func @transform_4(%arg0: i32) -> (i32, i32) {
    %c0_i32 = arith.constant 0 : i32
    %c0_i32_0 = arith.constant 0 : i32
    %c0_i32_1 = arith.constant 0 : i32
    return %c0_i32, %c0_i32_0 : i32, i32
  }
  func.func @transform_5(%arg0: i32) -> (i32, i32) {
    %c0_i32 = arith.constant 0 : i32
    %c0_i32_0 = arith.constant 0 : i32
    return %c0_i32, %arg0 : i32, i32
  }
}

</mosaic_0001>

<bundles_post_ra>
// kernel: tpu_custom_call.1
= control target key start
LH: loop header
LB: loop body
LE: loop exit
PB: predicated region body
PF: predicated region fallthrough
CT: control target
= control target key end

     0   :  { %10 = vsyncpa [#allocation3], 0  ;;  %s1065_s0 = inlined_call_operand.vmem [shape: f32[4,256], index: 0, kind: input, shape index: {}]   ;;  %s1066_s1 = inlined_call_operand.vmem [shape: f32[128,4], index: 1, kind: input, shape index: {}]   ;;  %s1067_s2 = inlined_call_operand.vmem [shape: f32[128,1], index: 2, kind: input, shape index: {}]   ;;  %s1068_s3 = inlined_call_operand.vmem [shape: f32[2,128], index: 3, kind: input, shape index: {}]   ;;  %s1069_s4 = inlined_call_operand.vmem [shape: f32[2,1], index: 4, kind: input, shape index: {}]   ;;  %s1070_s5 = inlined_call_operand.hbm [shape: f32[2,256], index: 5, kind: output, shape index: {}]  }
   0x1   :  { %12 = vsyncpa [#allocation3 + $0x1], 0  ;;  %s846_s18 = smov 0   ;;  %s848_s19 = smov 0  }
   0x2   :  { %s850_s20 = smov 0   ;;  %s852_s21 = smov 0  }
   0x3 LB: > { %s867_s22 = sadd.s32 4294967295, %s810_s21   ;;  %s625_s23 = sadd.s32 4294967294, %s810_s21   ;;  %s810_s21 = sphi %s852_s21, %s1076_s21   ;;  %s806_s20 = sphi %s850_s20, %s1075_s20   ;;  %s802_s19 = sphi %s848_s19, %s1074_s19   ;;  %s798_s18 = sphi %s846_s18, %s1073_s18  }
   0x4   : > { %s871_s24 = sadd.s32 1, %s810_s21   ;;  %s135_s25 = sadd.s32 1, %s806_s20 }
   0x5   : > { %s132_s26 = ssub.s32 %s810_s21, %s871_s24  ;;  %p145_p0 = scmp.ne.s32.totalorder %s806_s20, %s802_s19 }
   0x6   : > { %p133_p1 = scmp.eq.s32.totalorder %s132_s26, 0  ;;  %p146_p2 = scmp.eq.s32.totalorder %s867_s22, 1 }
   0x7   : > { %p151_p3 = scmp.ne.s32.totalorder %s802_s19, %s798_s18  ;;  %p152_p4 = scmp.eq.s32.totalorder %s625_s23, 1 }
   0x8   : > { %s882_s27 = scalar_select %p133_p1, %s806_s20, %s135_s25  }
   0x9   : > { %p884_p5 = por %p146_p2, %p145_p0  ;;  %p888_p6 = por %p152_p4, %p151_p3 }
   0xa   : > { %p628_p7 = scmp.ge.s32.totalorder %s810_s21, 1  ;;  %p189_p8 = scmp.lt.s32.totalorder %s810_s21, 3 }
   0xc   : > { %p190_p9 = pnand %p628_p7, %p189_p8 }
   0xd   : > { %p216_p10 = scmp.lt.s32.totalorder (!%p190_p9), %s867_s22, 1  ;;  %v223_v0 = vld [vmem:[%s1066_s1] sm:$0xff] (!%p190_p9)  ;;  %v224_v1 = vld [vmem:[%s1066_s1 + $0x8] sm:$0xff] (!%p190_p9)  ;;  %vm343_vm0 = vcmask (!%p190_p9), 31744   ;;  %v812_v3 = vmov (!%p190_p9), 0   ;;  %v225_v4 = vld [vmem:[%s1066_s1 + $0x10] sm:$0xff] (!%p190_p9) }
   0xe   : > { %193 = sbr.rel (%p190_p9) target bundleno = 544 (0x220), region = 40  ;;  %v239_v2 = vpack.c.bf16 (!%p190_p9), %v224_v1, %v223_v0  ;;  %742 = vset.pattern.permute.xlu0 (!%p190_p9), %v812_v3  ;;  %743 = vset.pattern.permute.xlu1 (!%p190_p9), %v812_v3  ;;  %v247_v5 = vld [vmem:[%s1067_s2] sm:$0xff] (!%p190_p9)  ;;  %vm368_vm1 = vcmask (!%p190_p9), 1041408   ;;  %v226_v7 = vld [vmem:[%s1066_s1 + $0x18] sm:$0xff] (!%p190_p9)  ;;  %v249_v8 = vld [vmem:[%s1067_s2 + $0x10] sm:$0xff] (!%p190_p9)  ;;  %v813_v45 = vmov (!%p190_p9), 0.0  }
   0xf   : > { %265 = vperm.xlu0 (!%p190_p9), %742, %v247_v5   ;;  %v227_v10 = vld [vmem:[%s1066_s1 + $0x20] sm:$0xff] (!%p190_p9)  ;;  %v228_v11 = vld [vmem:[%s1066_s1 + $0x28] sm:$0xff] (!%p190_p9)  ;;  %275 = vperm.xlu1 (!%p190_p9), %743, %v249_v8   ;;  %v250_v13 = vld [vmem:[%s1067_s2 + $0x18] sm:$0xff] (!%p190_p9)  ;;  %v240_v15 = vpack.c.bf16 (!%p190_p9), %v226_v7, %v225_v4  ;;  %vm814_vm2 = vmmov (!%p190_p9), 0   ;;  %s213_s14 = sand.u32 (!%p190_p9), 1, %s802_s19   ;;  %s640_s16 = sshll.u32 (!%p190_p9), %s867_s22, 5 }
  0x10   : > { %663 = vmatprep.mubr.msk.bf16.mxu0 (!%p190_p9), %vm343_vm0, %v239_v2  ;;  %v248_v12 = vld [vmem:[%s1067_s2 + $0x8] sm:$0xff] (!%p190_p9)  ;;  %v241_v16 = vpack.c.bf16 (!%p190_p9), %v228_v11, %v227_v10  ;;  %v251_v17 = vld [vmem:[%s1067_s2 + $0x20] sm:$0xff] (!%p190_p9)  ;;  %v229_v19 = vld [vmem:[%s1066_s1 + $0x30] sm:$0xff] (!%p190_p9)  ;;  %679 = vmatprep.subr.bf16.mxu1 (!%p190_p9), %v813_v45  ;;  %s629_s15 = sshll.u32 (!%p190_p9), %s213_s14, 1  ;;  %s1023_s30 = scalar_lea.hbm (!%p190_p9), %s1070_s5, %s640_s16 }
  0x11   : > { %v252_v18 = vld [vmem:[%s1067_s2 + $0x28] sm:$0xff] (!%p190_p9)  ;;  %v230_v20 = vld [vmem:[%s1066_s1 + $0x38] sm:$0xff] (!%p190_p9)  ;;  %v231_v21 = vld [vmem:[%s1066_s1 + $0x40] sm:$0xff] (!%p190_p9)  ;;  %695 = vmatprep.mubr.msk.bf16.mxu1 (!%p190_p9), %vm814_vm2, %v813_v45  ;;  %s215_s17 = scalar_lea.vmem (!%p190_p9), [#allocation2], %s629_s15  ;;  %s553_s6 = scalar_lea.sflag (!%p190_p9), [#allocation3], %s213_s14 }
  0x12   : > { %v232_v22 = vld [vmem:[%s1066_s1 + $0x48] sm:$0xff] (!%p190_p9)  ;;  %v253_v23 = vld [vmem:[%s1067_s2 + $0x30] sm:$0xff] (!%p190_p9)  ;;  %v254_v24 = vld [vmem:[%s1067_s2 + $0x38] sm:$0xff] (!%p190_p9)  ;;  %v242_v25 = vpack.c.bf16 (!%p190_p9), %v230_v20, %v229_v19  ;;  %s566_s23 = sshll.u32 (!%p190_p9), %s215_s17, 4  ;;  %s1025_s23 = int_to_ptr.vmem [resolvable:$true] %s566_s23 }
  0x13   : > { %270 = vperm.xlu0 (!%p190_p9), %742, %v248_v12   ;;  %280 = vperm.xlu1 (!%p190_p9), %743, %v250_v13   ;;  %v243_v26 = vpack.c.bf16 (!%p190_p9), %v232_v22, %v231_v21  ;;  %v255_v27 = vld [vmem:[%s1067_s2 + $0x40] sm:$0xff] (!%p190_p9)  ;;  %v256_v28 = vld [vmem:[%s1067_s2 + $0x48] sm:$0xff] (!%p190_p9)  ;;  %v233_v29 = vld [vmem:[%s1066_s1 + $0x50] sm:$0xff] (!%p190_p9)  ;;  %s748_s7 = scalar_lea.vmem (!%p190_p9), %s1025_s23, 32 }
  0x14   : > { %v234_v30 = vld [vmem:[%s1066_s1 + $0x58] sm:$0xff] (!%p190_p9)  ;;  %v235_v31 = vld [vmem:[%s1066_s1 + $0x60] sm:$0xff] (!%p190_p9)  ;;  %v236_v32 = vld [vmem:[%s1066_s1 + $0x68] sm:$0xff] (!%p190_p9)  ;;  %p749_p11 = scmp.ne.s32.totalorder (!%p190_p9), %s1025_s23, %s748_s7 }
  0x15   : > { %s217_s9 = scalar_select %p216_p10, %s867_s22, 1  ;;  %v257_v33 = vld [vmem:[%s1067_s2 + $0x50] sm:$0xff]  ;;  %v258_v34 = vld [vmem:[%s1067_s2 + $0x58] sm:$0xff]  ;;  %v244_v35 = vpack.c.bf16 %v234_v30, %v233_v29  ;;  %v245_v36 = vpack.c.bf16 %v236_v32, %v235_v31  ;;  %v259_v37 = vld [vmem:[%s1067_s2 + $0x60] sm:$0xff] }
  0x16   : > { %v260_v38 = vld [vmem:[%s1067_s2 + $0x68] sm:$0xff]  ;;  %v237_v39 = vld [vmem:[%s1066_s1 + $0x70] sm:$0xff]  ;;  %v238_v40 = vld [vmem:[%s1066_s1 + $0x78] sm:$0xff]  ;;  %p750_p12 = pnand %p749_p11, %p884_p5  ;;  %s815_s22 = smov [#allocation2]  }
  0x17   : > { %s630_s10 = sshll.u32 %s217_s9, 2  ;;  %285 = vperm.xlu0 %742, %v251_v17   ;;  %290 = vperm.xlu1 %743, %v252_v18   ;;  %v261_v41 = vld [vmem:[%s1067_s2 + $0x70] sm:$0xff]  ;;  %v262_v42 = vld [vmem:[%s1067_s2 + $0x78] sm:$0xff]  ;;  %v246_v43 = vpack.c.bf16 %v238_v40, %v237_v39  ;;  %v495_v44 = vld [vmem:[%s1069_s4] sm:$0x3]  ;;  %s752_s8 = sshll.u32 %s815_s22, 4  ;;  %s753_s8 = int_to_ptr.vmem [resolvable:$false] %s752_s8 }
  0x18   : > { %s219_s13 = scalar_lea.vmem %s1065_s0, %s630_s10  ;;  %p751_p13 = pneg %p750_p12 }
  0x19   : > { %v221_v6 = vld [vmem:[%s219_s13] sm:$0xf]  ;;  %s754_s9 = scalar_lea.vmem %s753_s8, 64  ;;  %p755_p0 = scmp.lt.s32.totalorder %s1025_s23, %s753_s8 }
  0x1a   : > { %v222_v9 = vpack.c.bf16 %v221_v6, %v221_v6  ;;  %p756_p1 = scmp.lt.s32.totalorder %s754_s9, %s748_s7 }
  0x1b   : > { %295 = vperm.xlu0 %742, %v253_v23   ;;  %300 = vperm.xlu1 %743, %v254_v24  }
  0x1c   : > { %699 = vmatprep.subr.msk.bf16.mxu0 %vm368_vm1, %v222_v9  ;;  %v370_v14 = vsel %vm368_vm1, %v222_v9, 0  ;;  %p757_p2 = por %p756_p1, %p755_p0 }
  0x1d   : > { %662 = vmatpush3.bf16.msra.mxu0 %v370_v14 }
  0x1e   : > { %p758_p3 = pnand %p757_p2, %p751_p13 }
  0x1f   : > { %305 = vperm.xlu0 %742, %v255_v27   ;;  %310 = vperm.xlu1 %743, %v256_v28  }
  0x20   : > { %664 = vmatmul.mubr.msk.bf16.vlgmr.msra.gmra.mrb[0].mxu0 %vm343_vm0, %v240_v15 }
  0x21   : > { %667 = vmatprep.mubr.msk.bf16.mxu0 %vm343_vm0, %v241_v16 }
  0x23   : > { %315 = vperm.xlu0 %742, %v257_v33   ;;  %320 = vperm.xlu1 %743, %v258_v34  }
  0x27   : > { %325 = vperm.xlu0 %742, %v259_v37   ;;  %330 = vperm.xlu1 %743, %v260_v38  }
  0x28   : > { %668 = vmatmul.mubr.msk.bf16.gmra.mrb[4].mxu0 %vm343_vm0, %v242_v25 }
  0x29   : > { %671 = vmatprep.mubr.msk.bf16.mxu0 %vm343_vm0, %v243_v26 }
  0x2b   : > { %335 = vperm.xlu0 %742, %v261_v41   ;;  %340 = vperm.xlu1 %743, %v262_v42  }
  0x2f   : > { %498 = vperm.xlu0 %742, %v495_v44  }
  0x30   : > { %672 = vmatmul.mubr.msk.bf16.gmra.mrb[8].mxu0 %vm343_vm0, %v244_v35 }
  0x31   : > { %675 = vmatprep.mubr.msk.bf16.mxu0 %vm343_vm0, %v245_v36 }
  0x38   : > { %676 = vmatmul.mubr.msk.bf16.gmra.mrb[12].mxu0 %vm343_vm0, %v246_v43 }
  0x8e   : > { %v266_v46 = vpop.permute.xlu0 %265  ;;  %v276_v47 = vpop.permute.xlu1 %275 }
  0x92   : > { %v271_v48 = vpop.permute.xlu0 %270  ;;  %v281_v49 = vpop.permute.xlu1 %280 }
  0x96   : > { %v286_v50 = vpop.permute.xlu0 %285  ;;  %v291_v51 = vpop.permute.xlu1 %290 }
  0x9a   : > { %v296_v52 = vpop.permute.xlu0 %295  ;;  %v301_v56 = vpop.permute.xlu1 %300 }
  0x9e   : > { %v306_v0 = vpop.permute.xlu0 %305  ;;  %v311_v4 = vpop.permute.xlu1 %310 }
  0xa2   : > { %v316_v13 = vpop.permute.xlu0 %315  ;;  %v321_v17 = vpop.permute.xlu1 %320 }
  0xa6   : > { %v326_v25 = vpop.permute.xlu0 %325  ;;  %v331_v30 = vpop.permute.xlu1 %330 }
  0xaa   : > { %v336_v37 = vpop.permute.xlu0 %335  ;;  %v341_v42 = vpop.permute.xlu1 %340 }
  0xf3   : > { %v665_v53 = vpop.f32.mrb[0].mxu0 }
  0xf4   : > { %v415_v54 = vadd.f32 %v665_v53, %v276_v47  ;;  %v406_v55 = vpop.f32.mrb[1].mxu0 }
  0xf5   : > { %v407_v57 = vadd.f32 %v406_v55, %v266_v46  ;;  %v666_v58 = vpop.f32.mrb[2].mxu0  ;;  %v485_v55 = vld [vmem:[%s1068_s3] sm:$0x3] }
  0xf6   : > { %v418_v59 = vadd.f32 %v666_v58, %v281_v49  ;;  %v409_v60 = vpop.f32.mrb[3].mxu0  ;;  %v471_v62 = vmax.f32 %v415_v54, 0.0 }
  0xf7   : > { %v410_v61 = vadd.f32 %v409_v60, %v271_v48  ;;  %v469_v1 = vmax.f32 %v407_v57, 0.0  ;;  %v499_v57 = vpop.permute.xlu0 %498 }
  0xf8   : > { %v472_v63 = vmax.f32 %v418_v59, 0.0 }
  0xf9   : > { %v470_v2 = vmax.f32 %v410_v61, 0.0 }
  0xfa   : > { %v488_v3 = vpack.c.bf16 %v472_v63, %v471_v62 }
  0xfb   : > { %v669_v5 = vpop.f32.mrb[4].mxu0  ;;  %v487_v6 = vpack.c.bf16 %v470_v2, %v469_v1 }
  0xfc   : > { %v431_v7 = vadd.f32 %v669_v5, %v296_v52  ;;  %v422_v8 = vpop.f32.mrb[5].mxu0 }
  0xfd   : > { %v423_v9 = vadd.f32 %v422_v8, %v286_v50  ;;  %v670_v10 = vpop.f32.mrb[6].mxu0  ;;  %680 = vmatpush3.bf16.msra.mxu1 %v487_v6 }
  0xfe   : > { %v434_v11 = vadd.f32 %v670_v10, %v301_v56  ;;  %v425_v12 = vpop.f32.mrb[7].mxu0  ;;  %681 = vmatprep.subr.bf16.mxu1 %v813_v45  ;;  %v475_v15 = vmax.f32 %v431_v7, 0.0  ;;  %v486_v56 = vpack.c.bf16 %v485_v55, %v485_v55 }
  0xff   : > { %v426_v14 = vadd.f32 %v425_v12, %v291_v51  ;;  %v473_v18 = vmax.f32 %v423_v9, 0.0 }
 0x100   : > { %v476_v16 = vmax.f32 %v434_v11, 0.0 }
 0x101   : > { %v474_v19 = vmax.f32 %v426_v14, 0.0  ;;  %682 = vmatpush3.bf16.msra.mxu1 %v488_v3 }
 0x102   : > { %v490_v20 = vpack.c.bf16 %v476_v16, %v475_v15  ;;  %683 = vmatprep.subr.bf16.mxu1 %v813_v45 }
 0x103   : > { %v489_v21 = vpack.c.bf16 %v474_v19, %v473_v18  ;;  %v673_v22 = vpop.f32.mrb[8].mxu0 }
 0x104   : > { %v447_v23 = vadd.f32 %v673_v22, %v316_v13  ;;  %v438_v24 = vpop.f32.mrb[9].mxu0 }
 0x105   : > { %v439_v26 = vadd.f32 %v438_v24, %v306_v0  ;;  %v674_v27 = vpop.f32.mrb[10].mxu0  ;;  %684 = vmatpush3.bf16.msra.mxu1 %v489_v21 }
 0x106   : > { %v450_v28 = vadd.f32 %v674_v27, %v321_v17  ;;  %v441_v29 = vpop.f32.mrb[11].mxu0  ;;  %685 = vmatprep.subr.bf16.mxu1 %v813_v45  ;;  %v479_v32 = vmax.f32 %v447_v23, 0.0 }
 0x107   : > { %v442_v31 = vadd.f32 %v441_v29, %v311_v4  ;;  %v477_v34 = vmax.f32 %v439_v26, 0.0 }
 0x108   : > { %v480_v33 = vmax.f32 %v450_v28, 0.0 }
 0x109   : > { %v478_v35 = vmax.f32 %v442_v31, 0.0  ;;  %686 = vmatpush3.bf16.msra.mxu1 %v490_v20 }
 0x10a   : > { %v492_v36 = vpack.c.bf16 %v480_v33, %v479_v32  ;;  %687 = vmatprep.subr.bf16.mxu1 %v813_v45 }
 0x10b   : > { %v491_v38 = vpack.c.bf16 %v478_v35, %v477_v34  ;;  %v677_v39 = vpop.f32.mrb[12].mxu0 }
 0x10c   : > { %v463_v40 = vadd.f32 %v677_v39, %v336_v37  ;;  %v454_v41 = vpop.f32.mrb[13].mxu0 }
 0x10d   : > { %v455_v43 = vadd.f32 %v454_v41, %v326_v25  ;;  %v678_v44 = vpop.f32.mrb[14].mxu0  ;;  %688 = vmatpush3.bf16.msra.mxu1 %v491_v38 }
 0x10e   : > { %v466_v46 = vadd.f32 %v678_v44, %v341_v42  ;;  %v457_v47 = vpop.f32.mrb[15].mxu0  ;;  %689 = vmatprep.subr.bf16.mxu1 %v813_v45  ;;  %v483_v49 = vmax.f32 %v463_v40, 0.0 }
 0x10f   : > { %v458_v48 = vadd.f32 %v457_v47, %v331_v30  ;;  %v481_v51 = vmax.f32 %v455_v43, 0.0 }
 0x110   : > { %v484_v50 = vmax.f32 %v466_v46, 0.0 }
 0x111   : > { %v482_v52 = vmax.f32 %v458_v48, 0.0  ;;  %690 = vmatpush3.bf16.msra.mxu1 %v492_v36 }
 0x112   : > { %v494_v53 = vpack.c.bf16 %v484_v50, %v483_v49  ;;  %691 = vmatprep.subr.bf16.mxu1 %v813_v45 }
 0x113   : > { %v493_v54 = vpack.c.bf16 %v482_v52, %v481_v51 }
 0x115   : > { %692 = vmatpush3.bf16.msra.mxu1 %v493_v54 }
 0x116   : > { %693 = vmatprep.subr.bf16.mxu1 %v813_v45 }
 0x119   : > { %694 = vmatpush3.bf16.msra.mxu1 %v494_v53 }
 0x11c   : > { %696 = vmatmul.mubr.bf16.vlgmr.msra.gmra.mrb[0].mxu1 %v486_v56 }
 0x1ef   : > { %v535_v58 = vpop.f32.mrb[0].mxu1 }
 0x1f0   : > { %v536_v59 = vadd.f32 %v535_v58, %v499_v57  ;;  %v697_v60 = vpop.f32.mrb[1].mxu1 }
 0x1f1   : > { %v538_v61 = vpop.f32.mrb[2].mxu1 }
 0x1f2   : > { %v542_v62 = vrot.slane %v536_v59, 7  ;;  %v698_v63 = vpop.f32.mrb[3].mxu1 }
 0x1f4   : > { %v544_v0 = vsub.f32 %v536_v59, %v542_v62 }
 0x1f6   : > { %v545_v1 = vmul.f32 1.442695, %v544_v0 }
 0x1f8   : > { %744 = vpow2.f32 %v545_v1 }
 0x202   : > { %v745_v2 = vpop.eup %744 }
 0x203   : > { %v547_v3 = vadd.f32 1.0, %v745_v2 }
 0x205   : > { %746 = vrcp.f32 %v547_v3 }
 0x20f   : > { %v747_v45 = vpop.eup %746 }
 0x210   : > { %549 = vst [vmem:[%s215_s17 - $0x1] sm:$0x2] %v747_v45  ;;  %v550_v4 = vsub.f32 1.0, %v747_v45 }
 0x212   : > { %551 = vst [vmem:[%s215_s17] sm:$0x2] %v550_v4 }
 0x213   : > { %761 = shalt.err (!%p758_p3)
}
 0x214   : > { %s762_s10 = scalar_lea.hbm %s1023_s30, 32  ;;  %s766_s13 = scalar_lea.hbm %s1070_s5, 64 }
 0x215   : > { %p763_p4 = scmp.ne.s32.totalorder %s1023_s30, %s762_s10  ;;  %p767_p9 = scmp.lt.u32.totalorder %s1023_s30, %s1070_s5 }
 0x216   : > { %p768_p10 = scmp.lt.u32.totalorder %s766_s13, %s762_s10  ;;  %p770_p12 = scmp.lt.u32.totalorder %s762_s10, %s1023_s30 }
 0x217   : > { %p764_p7 = pnand %p763_p4, %p884_p5 }
 0x218   : > { %p769_p11 = por %p768_p10, %p767_p9 }
 0x219   : > { %p765_p8 = pneg %p764_p7 }
 0x21a   : > { %p771_p13 = por %p770_p12, %p769_p11 }
 0x21c   : > { %p772_p0 = pnand %p771_p13, %p765_p8 }
 0x21e   : > { %775 = shalt.err (!%p772_p0)
}
 0x21f   : > { %700 = dma.vmem_to_hbm [thread:$0]  (%p884_p5), %s1025_s23, 32, %s1023_s30, %s553_s6  }
 0x220 PF: > { %p706_p1 = scmp.ge.s32.totalorder %s810_s21, 2  ;;  %s578_s16 = sand.u32 1, %s798_s18  }
 0x221   : > { %s579_s17 = scalar_lea.sflag [#allocation3], %s578_s16 }
 0x222   : > { %p703_p2 = pnand %p706_p1, %p888_p6 }
 0x224   : > { %793 = dma.done.wait (!%p703_p2), %s579_s17, 32  }
 0x225   : > { %795 = vsyncadd (!%p703_p2), %s579_s17, 4294967264  ;;  %p15_p3 = scmp.ge.s32.totalorder %s871_s24, 4   ;;  %s1073_s18 = smov %s802_s19 }
 0x226   : > { %s1074_s19 = smov %s806_s20  ;;  %s1075_s20 = smov %s882_s27 }
 0x227   : > { %s1076_s21 = smov %s871_s24  ;;  %17 = sbr.rel (!%p15_p3) target bundleno = 3 (0x3), region = 75 }
 0x22e   :  { %584 = vsyncpa [#allocation3], 1 }
 0x22f   :  { %586 = vsyncpa [#allocation3 + $0x1], 1 }

</bundles_post_ra>
